<compile_context>
chip_gen: v5e
topology: v5e:2x2
jax: 0.10.0
libtpu: 0.0.40
codegen_flags: <defaults>
</compile_context>

<pallas_src>
import jax
import jax.numpy as jnp
from jax.experimental import pallas as pl
from jax.experimental.pallas import tpu as pltpu


def _round_up(x, m):
    return pl.cdiv(x, m) * m


def _gates_to_h(g, h2):
    """Fused-gate LSTM step with h0 = c0 = 0.

    g: (B, 4*h2) with 64-lane-aligned blocks [i | f | g | o], each h2 wide and
    internally packed [fwd | bwd].  The f block multiplies c0 == 0 and is
    skipped exactly.  Returns h = [h_fwd | h_bwd] of shape (B, h2), in f32.
    """
    i = jax.nn.sigmoid(g[:, 0:h2])
    gg = jnp.tanh(g[:, 2 * h2:3 * h2])
    o = jax.nn.sigmoid(g[:, 3 * h2:4 * h2])
    return o * jnp.tanh(i * gg)


def keystroke_kernel(
    keycode_ref, dfht_ref,
    wtime_ref, btime_ref,
    t0_ref, w0t_ref, b0_ref,
    w1_ref, b1_ref,
    wfc_ref, bfc_ref,
    out_ref,
):
    bt = keycode_ref.shape[0]
    num_emb = t0_ref.shape[0]          # 256
    h2 = w1_ref.shape[0]               # 2H

    # --- Embedding lookup as a one-hot matmul against the pre-folded table --
    kc = keycode_ref[...]                                           # (bt,1) i32
    iota = jax.lax.broadcasted_iota(jnp.int32, (bt, num_emb), 1)
    onehot = (iota == kc).astype(jnp.bfloat16)                      # (bt,256)

    # --- Packed df/ht linears: relu((bt,2) @ (2,2E) + b) in f32 -------------
    time_e = jnp.maximum(
        jnp.dot(dfht_ref[...], wtime_ref[...],
                preferred_element_type=jnp.float32) + btime_ref[...], 0.0)

    # --- Layer-0 fused gates: one lane-dense 256-wide MXU result ------------
    g0 = (jnp.dot(onehot, t0_ref[...], preferred_element_type=jnp.float32)
          + jnp.dot(time_e.astype(jnp.bfloat16), w0t_ref[...],
                    preferred_element_type=jnp.float32)
          + b0_ref[...])                                            # (bt, 8H)
    out0 = _gates_to_h(g0, h2)                                      # (bt, 2H)

    # --- Layer-1 fused gates -------------------------------------------------
    g1 = (jnp.dot(out0.astype(jnp.bfloat16), w1_ref[...],
                  preferred_element_type=jnp.float32) + b1_ref[...])
    lstm_out = _gates_to_h(g1, h2)                                  # (bt, 2H)

    # --- Attention over a length-1 sequence is identically 1 ----------------
    # context == lstm_out exactly, so the attention matmuls are skipped.

    # --- Final classifier, lane-dense (128-wide, zero-padded) ---------------
    out_ref[...] = (jnp.dot(lstm_out, wfc_ref[...],
                            preferred_element_type=jnp.float32) + bfc_ref[...])


def keystroke_classifier(keycode, df, ht, packed, block_b=256):
    """packed = output of pack_params(). Returns (B, 2) logits."""
    B = keycode.shape[0]
    bt = min(block_b, _round_up(B, 8))
    Bp = _round_up(B, bt)
    pad = Bp - B

    kc = jnp.pad(keycode.astype(jnp.int32), (0, pad)).reshape(Bp, 1)
    dfht = jnp.stack([df, ht], axis=-1).astype(jnp.float32)
    dfht = jnp.pad(dfht, ((0, pad), (0, 0)))                        # (Bp, 2)

    weights = list(packed)
    in_specs = (
        [pl.BlockSpec((bt, 1), lambda i: (i, 0)),
         pl.BlockSpec((bt, 2), lambda i: (i, 0))] +
        [pl.BlockSpec(w.shape, lambda i: (0, 0)) for w in weights]
    )
    out = pl.pallas_call(
        keystroke_kernel,
        out_shape=jax.ShapeDtypeStruct((Bp, 128), jnp.float32),
        grid=(Bp // bt,),
        in_specs=in_specs,
        out_specs=pl.BlockSpec((bt, 128), lambda i: (i, 0)),
        compiler_params=pltpu.CompilerParams(
            dimension_semantics=("parallel",)),
    )(kc, dfht, *weights)
    return out[:B, :2]


def init_params(key, key_embed_size=16, time_embed_size=8,
                lstm_hidden_size=32, attention_size=16):
    """Random params in 'torch-like' layout (weights stored transposed)."""
    K, E, H, A = key_embed_size, time_embed_size, lstm_hidden_size, attention_size
    D = K + 2 * E
    ks = jax.random.split(key, 19)
    s = 0.1

    def rnd(k, shape):
        return jax.random.normal(k, shape, jnp.float32) * s

    embed = rnd(ks[0], (256, K))
    wdf, bdf = rnd(ks[1], (1, E)), rnd(ks[2], (1, E))
    wht, bht = rnd(ks[3], (1, E)), rnd(ks[4], (1, E))
    # LSTM input weights stored (input, 4H); biases are b_ih + b_hh folded.
    wih0f, b0f = rnd(ks[5], (D, 4 * H)), rnd(ks[6], (1, 4 * H))
    wih0b, b0b = rnd(ks[7], (D, 4 * H)), rnd(ks[8], (1, 4 * H))
    wih1f, b1f = rnd(ks[9], (2 * H, 4 * H)), rnd(ks[10], (1, 4 * H))
    wih1b, b1b = rnd(ks[11], (2 * H, 4 * H)), rnd(ks[12], (1, 4 * H))
    watt, batt = rnd(ks[13], (2 * H, A)), rnd(ks[14], (1, A))
    wattc, battc = rnd(ks[15], (A, 1)), rnd(ks[16], (1, 1))
    wfc, bfc = rnd(ks[17], (2 * H, 2)), rnd(ks[18], (1, 2))
    return [embed, wdf, bdf, wht, bht,
            wih0f, b0f, wih0b, b0b, wih1f, b1f, wih1b, b1b,
            watt, batt, wattc, battc, wfc, bfc]


def pack_params(params, key_embed_size=16, time_embed_size=8,
                lstm_hidden_size=32):
    """Fuse / fold weights into the layout the kernel expects (done once)."""
    (embed, wdf, bdf, wht, bht,
     wih0f, b0f, wih0b, b0b, wih1f, b1f, wih1b, b1b,
     watt, batt, wattc, battc, wfc, bfc) = params
    K, E, H = key_embed_size, time_embed_size, lstm_hidden_size
    H2 = 2 * H

    def fuse(wf, wb, bf, bb):
        # Per-direction columns are [i f g o] (H each).  Interleave fwd/bwd per
        # gate so fused columns are 2H-wide blocks [i | f | g | o].
        cols_w, cols_b = [], []
        for g in range(4):
            cols_w.append(wf[:, g * H:(g + 1) * H])
            cols_w.append(wb[:, g * H:(g + 1) * H])
            cols_b.append(bf[:, g * H:(g + 1) * H])
            cols_b.append(bb[:, g * H:(g + 1) * H])
        return jnp.concatenate(cols_w, axis=1), jnp.concatenate(cols_b, axis=1)

    w0, b0 = fuse(wih0f, wih0b, b0f, b0b)          # (K+2E, 8H), (1, 8H)
    w1, b1 = fuse(wih1f, wih1b, b1f, b1b)          # (2H, 8H),   (1, 8H)

    # Fold the embedding table into the layer-0 key weights (done once, f32).
    t0 = embed @ w0[:K, :]                          # (256, 8H)
    w0_time = w0[K:, :]                             # (2E, 8H)  rows: [df | ht]

    # Pack the two 1->E linears into one block-diagonal (2, 2E) weight.
    wtime = jnp.zeros((2, 2 * E), jnp.float32)
    wtime = wtime.at[0, :E].set(wdf[0])
    wtime = wtime.at[1, E:].set(wht[0])
    btime = jnp.concatenate([bdf, bht], axis=1)     # (1, 2E)

    # Lane-dense final classifier: pad 2 -> 128 output lanes with zeros.
    wfc_pad = jnp.zeros((H2, 128), jnp.float32).at[:, :2].set(wfc)
    bfc_pad = jnp.zeros((1, 128), jnp.float32).at[:, :2].set(bfc)

    bf16 = jnp.bfloat16
    # Attention weights (watt/batt/wattc/battc) are dead compute and dropped.
    return [wtime, btime,
            t0.astype(bf16), w0_time.astype(bf16), b0,
            w1.astype(bf16), b1,
            wfc_pad, bfc_pad]


def reference(keycode, df, ht, params):
    """Pure-JAX reference mirroring the PyTorch forward (eval mode)."""
    (embed, wdf, bdf, wht, bht,
     wih0f, b0f, wih0b, b0b, wih1f, b1f, wih1b, b1b,
     watt, batt, wattc, battc, wfc, bfc) = params
    key_e = embed[keycode]
    df_e = jax.nn.relu(df[:, None] * wdf + bdf)
    ht_e = jax.nn.relu(ht[:, None] * wht + bht)
    x = jnp.concatenate([key_e, df_e, ht_e], axis=-1)

    def step(inp, w, b):
        H = w.shape[1] // 4
        g = inp @ w + b
        i = jax.nn.sigmoid(g[:, :H])
        gg = jnp.tanh(g[:, 2 * H:3 * H])
        o = jax.nn.sigmoid(g[:, 3 * H:])
        return o * jnp.tanh(i * gg)

    out0 = jnp.concatenate([step(x, wih0f, b0f), step(x, wih0b, b0b)], -1)
    lstm_out = jnp.concatenate(
        [step(out0, wih1f, b1f), step(out0, wih1b, b1b)], -1)
    a = jnp.tanh(lstm_out @ watt + batt)
    score = a @ wattc + battc                                  # (B, 1)
    w = jax.nn.softmax(score[:, None, :], axis=1)[:, 0, :]     # length-1 -> 1.0
    context = w * lstm_out
    return context @ wfc + bfc


if __name__ == "__main__":
    root = jax.random.PRNGKey(0)
    kp, ki, kd, kh = jax.random.split(root, 4)

    B = 8
    params = init_params(kp)
    packed = pack_params(params)
    keycode = jax.random.randint(ki, (B,), 0, 256, dtype=jnp.int32)
    df = jax.random.uniform(kd, (B,), jnp.float32)
    ht = jax.random.uniform(kh, (B,), jnp.float32)

    out = keystroke_classifier(keycode, df, ht, packed)
    out = jax.block_until_ready(out)

    ref = reference(keycode, df, ht, params)
    assert out.shape == (B, 2)
    assert bool(jnp.all(jnp.isfinite(out)))
    err = float(jnp.max(jnp.abs(out - ref)))
    assert err < 5e-2, f"kernel/reference mismatch: {err}"
    print("KERNEL_OK")
</pallas_src>

<mosaic_0001>
module attributes {stable_mosaic.version = 11 : i64} {
  func.func @keystroke_kernel(%arg0: i32, %arg1: memref<8x1xi32, #tpu.memory_space<vmem>>, %arg2: memref<8x2xf32, #tpu.memory_space<vmem>>, %arg3: memref<2x16xf32, #tpu.memory_space<vmem>>, %arg4: memref<1x16xf32, #tpu.memory_space<vmem>>, %arg5: memref<256x256xbf16, #tpu.memory_space<vmem>>, %arg6: memref<16x256xbf16, #tpu.memory_space<vmem>>, %arg7: memref<1x256xf32, #tpu.memory_space<vmem>>, %arg8: memref<64x256xbf16, #tpu.memory_space<vmem>>, %arg9: memref<1x256xf32, #tpu.memory_space<vmem>>, %arg10: memref<64x128xf32, #tpu.memory_space<vmem>>, %arg11: memref<1x128xf32, #tpu.memory_space<vmem>>, %arg12: memref<8x128xf32, #tpu.memory_space<vmem>>) attributes {dimension_semantics = [#tpu.dimension_semantics<parallel>], iteration_bounds = array<i64: 1>, scalar_prefetch = 0 : i64, scratch_operands = 0 : i64, tpu.core_type = #tpu.core_type<tc>, window_params = [{transform_indices = @transform_0, window_bounds = array<i64: 8, 1>}, {transform_indices = @transform_1, window_bounds = array<i64: 8, 2>}, {pipeline_mode = #tpu.pipeline_mode<synchronous>, transform_indices = @transform_2, window_bounds = array<i64: 2, 16>}, {pipeline_mode = #tpu.pipeline_mode<synchronous>, transform_indices = @transform_3, window_bounds = array<i64: 1, 16>}, {pipeline_mode = #tpu.pipeline_mode<synchronous>, transform_indices = @transform_4, window_bounds = array<i64: 256, 256>}, {pipeline_mode = #tpu.pipeline_mode<synchronous>, transform_indices = @transform_5, window_bounds = array<i64: 16, 256>}, {pipeline_mode = #tpu.pipeline_mode<synchronous>, transform_indices = @transform_6, window_bounds = array<i64: 1, 256>}, {pipeline_mode = #tpu.pipeline_mode<synchronous>, transform_indices = @transform_7, window_bounds = array<i64: 64, 256>}, {pipeline_mode = #tpu.pipeline_mode<synchronous>, transform_indices = @transform_8, window_bounds = array<i64: 1, 256>}, {pipeline_mode = #tpu.pipeline_mode<synchronous>, transform_indices = @transform_9, window_bounds = array<i64: 64, 128>}, {pipeline_mode = #tpu.pipeline_mode<synchronous>, transform_indices = @transform_10, window_bounds = array<i64: 1, 128>}, {transform_indices = @transform_11, window_bounds = array<i64: 8, 128>}]} {
    %c0 = arith.constant 0 : index
    %c0_0 = arith.constant 0 : index
    %0 = vector.load %arg1[%c0, %c0_0] : memref<8x1xi32, #tpu.memory_space<vmem>>, vector<8x1xi32>
    %1 = tpu.iota {dimensions = array<i32: 1>} : vector<8x256xi32>
    %2 = vector.broadcast %0 : vector<8x1xi32> to vector<8x256xi32>
    %3 = arith.cmpi eq, %1, %2 : vector<8x256xi32>
    %4 = arith.extui %3 : vector<8x256xi1> to vector<8x256xi32>
    %5 = arith.sitofp %4 : vector<8x256xi32> to vector<8x256xf32>
    %6 = arith.truncf %5 : vector<8x256xf32> to vector<8x256xbf16>
    %c0_1 = arith.constant 0 : index
    %c0_2 = arith.constant 0 : index
    %7 = vector.load %arg2[%c0_1, %c0_2] : memref<8x2xf32, #tpu.memory_space<vmem>>, vector<8x2xf32>
    %c0_3 = arith.constant 0 : index
    %c0_4 = arith.constant 0 : index
    %8 = vector.load %arg3[%c0_3, %c0_4] : memref<2x16xf32, #tpu.memory_space<vmem>>, vector<2x16xf32>
    %cst = arith.constant dense<0.000000e+00> : vector<8x16xf32>
    %9 = tpu.matmul %7, %8, %cst {dimension_numbers = #tpu.dot_dimension_numbers<[1], [0], [0], [1], [0, 0, 1, 1], [], []>} : vector<8x2xf32>, vector<2x16xf32>, vector<8x16xf32> -> vector<8x16xf32>
    %c0_5 = arith.constant 0 : index
    %c0_6 = arith.constant 0 : index
    %10 = vector.load %arg4[%c0_5, %c0_6] : memref<1x16xf32, #tpu.memory_space<vmem>>, vector<1x16xf32>
    %11 = vector.broadcast %10 : vector<1x16xf32> to vector<8x16xf32>
    %12 = arith.addf %9, %11 : vector<8x16xf32>
    %cst_7 = arith.constant 0.000000e+00 : f32
    %13 = vector.broadcast %cst_7 : f32 to vector<8x16xf32>
    %14 = arith.maximumf %12, %13 : vector<8x16xf32>
    %c0_8 = arith.constant 0 : index
    %c0_9 = arith.constant 0 : index
    %15 = vector.load %arg5[%c0_8, %c0_9] : memref<256x256xbf16, #tpu.memory_space<vmem>>, vector<256x256xbf16>
    %cst_10 = arith.constant dense<0.000000e+00> : vector<8x256xf32>
    %16 = tpu.matmul %6, %15, %cst_10 {dimension_numbers = #tpu.dot_dimension_numbers<[1], [0], [0], [1], [0, 0, 1, 1], [], []>} : vector<8x256xbf16>, vector<256x256xbf16>, vector<8x256xf32> -> vector<8x256xf32>
    %17 = arith.truncf %14 : vector<8x16xf32> to vector<8x16xbf16>
    %c0_11 = arith.constant 0 : index
    %c0_12 = arith.constant 0 : index
    %18 = vector.load %arg6[%c0_11, %c0_12] : memref<16x256xbf16, #tpu.memory_space<vmem>>, vector<16x256xbf16>
    %cst_13 = arith.constant dense<0.000000e+00> : vector<8x256xf32>
    %19 = tpu.matmul %17, %18, %cst_13 {dimension_numbers = #tpu.dot_dimension_numbers<[1], [0], [0], [1], [0, 0, 1, 1], [], []>} : vector<8x16xbf16>, vector<16x256xbf16>, vector<8x256xf32> -> vector<8x256xf32>
    %20 = arith.addf %16, %19 : vector<8x256xf32>
    %c0_14 = arith.constant 0 : index
    %c0_15 = arith.constant 0 : index
    %21 = vector.load %arg7[%c0_14, %c0_15] : memref<1x256xf32, #tpu.memory_space<vmem>>, vector<1x256xf32>
    %22 = vector.broadcast %21 : vector<1x256xf32> to vector<8x256xf32>
    %23 = arith.addf %20, %22 : vector<8x256xf32>
    %24 = vector.extract_strided_slice %23 {offsets = [0, 0], sizes = [8, 64], strides = [1, 1]} : vector<8x256xf32> to vector<8x64xf32>
    %25 = arith.negf %24 : vector<8x64xf32>
    %26 = math.exp %25 : vector<8x64xf32>
    %cst_16 = arith.constant 1.000000e+00 : f32
    %27 = vector.broadcast %cst_16 : f32 to vector<8x64xf32>
    %28 = arith.addf %27, %26 : vector<8x64xf32>
    %29 = arith.divf %27, %28 : vector<8x64xf32>
    %30 = vector.extract_strided_slice %23 {offsets = [0, 128], sizes = [8, 64], strides = [1, 1]} : vector<8x256xf32> to vector<8x64xf32>
    %31 = math.tanh %30 : vector<8x64xf32>
    %32 = vector.extract_strided_slice %23 {offsets = [0, 192], sizes = [8, 64], strides = [1, 1]} : vector<8x256xf32> to vector<8x64xf32>
    %33 = arith.negf %32 : vector<8x64xf32>
    %34 = math.exp %33 : vector<8x64xf32>
    %cst_17 = arith.constant 1.000000e+00 : f32
    %35 = vector.broadcast %cst_17 : f32 to vector<8x64xf32>
    %36 = arith.addf %35, %34 : vector<8x64xf32>
    %37 = arith.divf %35, %36 : vector<8x64xf32>
    %38 = arith.mulf %29, %31 : vector<8x64xf32>
    %39 = math.tanh %38 : vector<8x64xf32>
    %40 = arith.mulf %37, %39 : vector<8x64xf32>
    %41 = arith.truncf %40 : vector<8x64xf32> to vector<8x64xbf16>
    %c0_18 = arith.constant 0 : index
    %c0_19 = arith.constant 0 : index
    %42 = vector.load %arg8[%c0_18, %c0_19] : memref<64x256xbf16, #tpu.memory_space<vmem>>, vector<64x256xbf16>
    %cst_20 = arith.constant dense<0.000000e+00> : vector<8x256xf32>
    %43 = tpu.matmul %41, %42, %cst_20 {dimension_numbers = #tpu.dot_dimension_numbers<[1], [0], [0], [1], [0, 0, 1, 1], [], []>} : vector<8x64xbf16>, vector<64x256xbf16>, vector<8x256xf32> -> vector<8x256xf32>
    %c0_21 = arith.constant 0 : index
    %c0_22 = arith.constant 0 : index
    %44 = vector.load %arg9[%c0_21, %c0_22] : memref<1x256xf32, #tpu.memory_space<vmem>>, vector<1x256xf32>
    %45 = vector.broadcast %44 : vector<1x256xf32> to vector<8x256xf32>
    %46 = arith.addf %43, %45 : vector<8x256xf32>
    %47 = vector.extract_strided_slice %46 {offsets = [0, 0], sizes = [8, 64], strides = [1, 1]} : vector<8x256xf32> to vector<8x64xf32>
    %48 = arith.negf %47 : vector<8x64xf32>
    %49 = math.exp %48 : vector<8x64xf32>
    %cst_23 = arith.constant 1.000000e+00 : f32
    %50 = vector.broadcast %cst_23 : f32 to vector<8x64xf32>
    %51 = arith.addf %50, %49 : vector<8x64xf32>
    %52 = arith.divf %50, %51 : vector<8x64xf32>
    %53 = vector.extract_strided_slice %46 {offsets = [0, 128], sizes = [8, 64], strides = [1, 1]} : vector<8x256xf32> to vector<8x64xf32>
    %54 = math.tanh %53 : vector<8x64xf32>
    %55 = vector.extract_strided_slice %46 {offsets = [0, 192], sizes = [8, 64], strides = [1, 1]} : vector<8x256xf32> to vector<8x64xf32>
    %56 = arith.negf %55 : vector<8x64xf32>
    %57 = math.exp %56 : vector<8x64xf32>
    %cst_24 = arith.constant 1.000000e+00 : f32
    %58 = vector.broadcast %cst_24 : f32 to vector<8x64xf32>
    %59 = arith.addf %58, %57 : vector<8x64xf32>
    %60 = arith.divf %58, %59 : vector<8x64xf32>
    %61 = arith.mulf %52, %54 : vector<8x64xf32>
    %62 = math.tanh %61 : vector<8x64xf32>
    %63 = arith.mulf %60, %62 : vector<8x64xf32>
    %c0_25 = arith.constant 0 : index
    %c0_26 = arith.constant 0 : index
    %64 = vector.load %arg10[%c0_25, %c0_26] : memref<64x128xf32, #tpu.memory_space<vmem>>, vector<64x128xf32>
    %cst_27 = arith.constant dense<0.000000e+00> : vector<8x128xf32>
    %65 = tpu.matmul %63, %64, %cst_27 {dimension_numbers = #tpu.dot_dimension_numbers<[1], [0], [0], [1], [0, 0, 1, 1], [], []>} : vector<8x64xf32>, vector<64x128xf32>, vector<8x128xf32> -> vector<8x128xf32>
    %c0_28 = arith.constant 0 : index
    %c0_29 = arith.constant 0 : index
    %66 = vector.load %arg11[%c0_28, %c0_29] : memref<1x128xf32, #tpu.memory_space<vmem>>, vector<1x128xf32>
    %67 = vector.broadcast %66 : vector<1x128xf32> to vector<8x128xf32>
    %68 = arith.addf %65, %67 : vector<8x128xf32>
    %c0_30 = arith.constant 0 : index
    %c0_31 = arith.constant 0 : index
    %69 = vector.load %arg12[%c0_30, %c0_31] : memref<8x128xf32, #tpu.memory_space<vmem>>, vector<8x128xf32>
    tpu.vector_store %arg12[%c0_30, %c0_31], %68 {strides = array<i32>} : memref<8x128xf32, #tpu.memory_space<vmem>>, vector<8x128xf32>,
    return
  }
  func.func @transform_0(%arg0: i32) -> (i32, i32) {
    %c0_i32 = arith.constant 0 : i32
    %c0_i32_0 = arith.constant 0 : i32
    return %arg0, %c0_i32 : i32, i32
  }
  func.func @transform_1(%arg0: i32) -> (i32, i32) {
    %c0_i32 = arith.constant 0 : i32
    %c0_i32_0 = arith.constant 0 : i32
    return %arg0, %c0_i32 : i32, i32
  }
  func.func @transform_2(%arg0: i32) -> (i32, i32) {
    %c0_i32 = arith.constant 0 : i32
    %c0_i32_0 = arith.constant 0 : i32
    %c0_i32_1 = arith.constant 0 : i32
    return %c0_i32, %c0_i32_0 : i32, i32
  }
  func.func @transform_3(%arg0: i32) -> (i32, i32) {
    %c0_i32 = arith.constant 0 : i32
    %c0_i32_0 = arith.constant 0 : i32
    %c0_i32_1 = arith.constant 0 : i32
    return %c0_i32, %c0_i32_0 : i32, i32
  }
  func.func @transform_4(%arg0: i32) -> (i32, i32) {
    %c0_i32 = arith.constant 0 : i32
    %c0_i32_0 = arith.constant 0 : i32
    %c0_i32_1 = arith.constant 0 : i32
    return %c0_i32, %c0_i32_0 : i32, i32
  }
  func.func @transform_5(%arg0: i32) -> (i32, i32) {
    %c0_i32 = arith.constant 0 : i32
    %c0_i32_0 = arith.constant 0 : i32
    %c0_i32_1 = arith.constant 0 : i32
    return %c0_i32, %c0_i32_0 : i32, i32
  }
  func.func @transform_6(%arg0: i32) -> (i32, i32) {
    %c0_i32 = arith.constant 0 : i32
    %c0_i32_0 = arith.constant 0 : i32
    %c0_i32_1 = arith.constant 0 : i32
    return %c0_i32, %c0_i32_0 : i32, i32
  }
  func.func @transform_7(%arg0: i32) -> (i32, i32) {
    %c0_i32 = arith.constant 0 : i32
    %c0_i32_0 = arith.constant 0 : i32
    %c0_i32_1 = arith.constant 0 : i32
    return %c0_i32, %c0_i32_0 : i32, i32
  }
  func.func @transform_8(%arg0: i32) -> (i32, i32) {
    %c0_i32 = arith.constant 0 : i32
    %c0_i32_0 = arith.constant 0 : i32
    %c0_i32_1 = arith.constant 0 : i32
    return %c0_i32, %c0_i32_0 : i32, i32
  }
  func.func @transform_9(%arg0: i32) -> (i32, i32) {
    %c0_i32 = arith.constant 0 : i32
    %c0_i32_0 = arith.constant 0 : i32
    %c0_i32_1 = arith.constant 0 : i32
    return %c0_i32, %c0_i32_0 : i32, i32
  }
  func.func @transform_10(%arg0: i32) -> (i32, i32) {
    %c0_i32 = arith.constant 0 : i32
    %c0_i32_0 = arith.constant 0 : i32
    %c0_i32_1 = arith.constant 0 : i32
    return %c0_i32, %c0_i32_0 : i32, i32
  }
  func.func @transform_11(%arg0: i32) -> (i32, i32) {
    %c0_i32 = arith.constant 0 : i32
    %c0_i32_0 = arith.constant 0 : i32
    return %arg0, %c0_i32 : i32, i32
  }
}

</mosaic_0001>

<bundles_post_ra>
// kernel: tpu_custom_call.1
= control target key start
LH: loop header
LB: loop body
LE: loop exit
PB: predicated region body
PF: predicated region fallthrough
CT: control target
= control target key end

     0   :  { %16 = vsyncpa [#allocation3], 0  ;;  %s1209_s0 = inlined_call_operand.vmem [shape: s32[8,1], index: 0, kind: input, shape index: {}]   ;;  %s1210_s1 = inlined_call_operand.vmem [shape: f32[8,2], index: 1, kind: input, shape index: {}]   ;;  %s1211_s2 = inlined_call_operand.vmem [shape: f32[2,16], index: 2, kind: input, shape index: {}]   ;;  %s1212_s3 = inlined_call_operand.hbm [shape: f32[1,16], index: 3, kind: input, shape index: {}]   ;;  %s1213_s4 = inlined_call_operand.hbm [shape: bf16[256,256], index: 4, kind: input, shape index: {}]   ;;  %s1214_s5 = inlined_call_operand.vmem [shape: bf16[16,256], index: 5, kind: input, shape index: {}]   ;;  %s1215_s6 = inlined_call_operand.vmem [shape: f32[1,256], index: 6, kind: input, shape index: {}]   ;;  %s1216_s7 = inlined_call_operand.hbm [shape: bf16[64,256], index: 7, kind: input, shape index: {}]   ;;  %s1217_s8 = inlined_call_operand.vmem [shape: f32[1,256], index: 8, kind: input, shape index: {}]   ;;  %s1218_s9 = inlined_call_operand.hbm [shape: f32[64,128], index: 9, kind: input, shape index: {}]   ;;  %s1219_s10 = inlined_call_operand.vmem [shape: f32[1,128], index: 10, kind: input, shape index: {}]   ;;  %s1220_s11 = inlined_call_operand.hbm [shape: f32[8,128], index: 11, kind: output, shape index: {}]  }
   0x1   :  { %17 = vsyncpa [#allocation6], 0 }
   0x2   :  { %18 = vsyncpa [#allocation9], 0  ;;  %s41_s19 = sshll.u32 %s1213_s4, 4  ;;  %s42_s19 = int_to_ptr.hbm [resolvable:$true] %s41_s19 }
   0x3   :  { %19 = vsyncpa [#allocation4], 0  ;;  %s1079_s20 = smov [#allocation5]   ;;  %s31_s24 = sshll.u32 %s1212_s3, 4  ;;  %s32_s24 = int_to_ptr.hbm [resolvable:$true] %s31_s24 }
   0x4   :  { %s43_s21 = sshll.u32 %s1079_s20, 4  ;;  %s1080_s25 = smov 128   ;;  %s44_s21 = int_to_ptr.vmem [resolvable:$true] %s43_s21 }
   0x5   :  { %s1081_s26 = smov 8   ;;  %s1082_s27 = smov [#allocation2]  }
   0x6   :  { %49 = dma.hbm_to_vmem [thread:$0]  %s42_s19, 4096, %s44_s21, [#allocation6], %s1080_s25, %s1080_s25, %s1081_s26  }
   0x7   :  { %s33_s28 = sshll.u32 %s1082_s27, 4  ;;  %s58_s12 = sshll.u32 %s1216_s7, 4  ;;  %s34_s28 = int_to_ptr.vmem [resolvable:$true] %s33_s28  ;;  %s59_s12 = int_to_ptr.hbm [resolvable:$true] %s58_s12 }
   0x8   :  { %36 = dma.hbm_to_vmem [thread:$0]  %s32_s24, 16, %s34_s28, [#allocation3]  }
   0x9   :  { %s73_s14 = sshll.u32 %s1218_s9, 4  ;;  %s1083_s15 = smov [#allocation7]   ;;  %s74_s14 = int_to_ptr.hbm [resolvable:$true] %s73_s14 }
   0xa   :  { %s60_s16 = sshll.u32 %s1083_s15, 4  ;;  %s1084_s3 = smov [#allocation8]   ;;  %s61_s16 = int_to_ptr.vmem [resolvable:$true] %s60_s16 }
   0xb   :  { %66 = dma.hbm_to_vmem [thread:$0]  %s59_s12, 1024, %s61_s16, [#allocation6], %s1080_s25, %s1080_s25, %s1081_s26  }
   0xc   :  { %s75_s17 = sshll.u32 %s1084_s3, 4  ;;  %s76_s17 = int_to_ptr.vmem [resolvable:$true] %s75_s17 }
   0xd   :  { %81 = dma.hbm_to_vmem [thread:$0]  %s74_s14, 1024, %s76_s17, [#allocation9], %s1080_s25, %s1080_s25, %s1081_s26  }
   0xe   :  { %1071 = dma.done.wait [#allocation3], 16  }
   0xf   :  { %1072 = vsyncadd [#allocation3], 4294967280 }
  0x10   :  { %1073 = dma.done.wait [#allocation6], 5120  }
  0x11   :  { %1074 = vsyncadd [#allocation6], 4294962176 }
  0x12   :  { %1075 = dma.done.wait [#allocation9], 1024  }
  0x13   :  { %1076 = vsyncadd [#allocation9], 4294966272  ;;  %v1085_v0 = vmov 0   ;;  %vm126_vm0 = vcmask 1041408   ;;  %vm122_vm1 = vcmask 15360   ;;  %v116_v2 = vld [vmem:[%s1210_s1] sm:$0xff] }
  0x14   :  { %924 = vset.pattern.permute.xlu0 %v1085_v0  ;;  %v117_v1 = vld [vmem:[%s1211_s2] sm:$0x3]  ;;  %v755_v4 = vld [vmem:[#allocation5 + $0x70] sm:$0xf]  ;;  %v887_v5 = vld [vmem:[#allocation5 + $0x74] sm:$0xf0] }
  0x15   :  { %v101_v3 = vld [vmem:[%s1209_s0] sm:$0xff]  ;;  %685 = vmatpush.msk.msra.mxu2 %vm126_vm0, %v117_v1  ;;  %v819_v6 = vld [vmem:[#allocation5 + $0xf0] sm:$0xf]  ;;  %v756_v7 = vor.u32 %v887_v5, %v755_v4  ;;  %v903_v8 = vld [vmem:[#allocation5 + $0xf4] sm:$0xf0]  ;;  %vm196_vm6 = vcmask 130048  }
  0x16   :  { %106 = vperm.xlu0 %924, %v101_v3   ;;  %686 = vmatmul.msk.f32.vlgmr.msra.gmra.mxu2 %vm122_vm1, %v116_v2  ;;  %v747_v9 = vld [vmem:[#allocation5 + $0x60] sm:$0xf]  ;;  %v885_v10 = vld [vmem:[#allocation5 + $0x64] sm:$0xf0]  ;;  %v820_v11 = vor.u32 %v903_v8, %v819_v6  ;;  %v739_v16 = vld [vmem:[#allocation5 + $0x50] sm:$0xf] }
  0x17   :  { %v811_v12 = vld [vmem:[#allocation5 + $0xe0] sm:$0xf]  ;;  %v901_v13 = vld [vmem:[#allocation5 + $0xe4] sm:$0xf0]  ;;  %386 = vmatpush.bf16.msra.mxu3 %v756_v7  ;;  %v748_v14 = vor.u32 %v885_v10, %v747_v9  ;;  %v883_v17 = vld [vmem:[#allocation5 + $0x54] sm:$0xf0] }
  0x18   :  { %399 = vmatpush.bf16.msra.mxu0 %v820_v11  ;;  %v812_v15 = vor.u32 %v901_v13, %v811_v12  ;;  %v803_v18 = vld [vmem:[#allocation5 + $0xd0] sm:$0xf]  ;;  %v899_v19 = vld [vmem:[#allocation5 + $0xd4] sm:$0xf0]  ;;  %v740_v20 = vor.u32 %v883_v17, %v739_v16  ;;  %v731_v22 = vld [vmem:[#allocation5 + $0x40] sm:$0xf] }
  0x19   :  { %v804_v21 = vor.u32 %v899_v19, %v803_v18  ;;  %v881_v23 = vld [vmem:[#allocation5 + $0x44] sm:$0xf0]  ;;  %v795_v24 = vld [vmem:[#allocation5 + $0xc0] sm:$0xf]  ;;  %v723_v28 = vld [vmem:[#allocation5 + $0x30] sm:$0xf] }
  0x1a   :  { %v897_v25 = vld [vmem:[#allocation5 + $0xc4] sm:$0xf0]  ;;  %v732_v26 = vor.u32 %v881_v23, %v731_v22  ;;  %v879_v29 = vld [vmem:[#allocation5 + $0x34] sm:$0xf0]  ;;  %v787_v30 = vld [vmem:[#allocation5 + $0xb0] sm:$0xf] }
  0x1b   :  { %387 = vmatpush.bf16.msra.mxu3 %v748_v14  ;;  %v796_v27 = vor.u32 %v897_v25, %v795_v24  ;;  %v895_v31 = vld [vmem:[#allocation5 + $0xb4] sm:$0xf0]  ;;  %v724_v32 = vor.u32 %v879_v29, %v723_v28  ;;  %v715_v34 = vld [vmem:[#allocation5 + $0x20] sm:$0xf]  ;;  %v877_v35 = vld [vmem:[#allocation5 + $0x24] sm:$0xf0] }
  0x1c   :  { %400 = vmatpush.bf16.msra.mxu0 %v812_v15  ;;  %v788_v33 = vor.u32 %v895_v31, %v787_v30  ;;  %v779_v36 = vld [vmem:[#allocation5 + $0xa0] sm:$0xf]  ;;  %v893_v37 = vld [vmem:[#allocation5 + $0xa4] sm:$0xf0]  ;;  %v716_v38 = vor.u32 %v877_v35, %v715_v34  ;;  %v707_v40 = vld [vmem:[#allocation5 + $0x10] sm:$0xf]  ;;  %v102_v15 = vlaneseq }
  0x1d   :  { %v780_v39 = vor.u32 %v893_v37, %v779_v36  ;;  %v875_v41 = vld [vmem:[#allocation5 + $0x14] sm:$0xf0]  ;;  %v771_v42 = vld [vmem:[#allocation5 + $0x90] sm:$0xf]  ;;  %v699_v46 = vld [vmem:[#allocation5] sm:$0xf] }
  0x1e   :  { %v891_v43 = vld [vmem:[#allocation5 + $0x94] sm:$0xf0]  ;;  %v708_v44 = vor.u32 %v875_v41, %v707_v40  ;;  %v873_v47 = vld [vmem:[#allocation5 + $0x4] sm:$0xf0]  ;;  %v763_v48 = vld [vmem:[#allocation5 + $0x80] sm:$0xf] }
  0x1f   :  { %388 = vmatpush.bf16.msra.mxu3 %v740_v20  ;;  %v772_v45 = vor.u32 %v891_v43, %v771_v42  ;;  %v889_v49 = vld [vmem:[#allocation5 + $0x84] sm:$0xf0]  ;;  %v700_v50 = vor.u32 %v873_v47, %v699_v46  ;;  %v689_v52 = vld [vmem:[%s1214_s5] sm:$0xf]  ;;  %v904_v54 = vld [vmem:[%s1214_s5 + $0x4] sm:$0xf] }
  0x20   :  { %401 = vmatpush.bf16.msra.mxu0 %v804_v21  ;;  %v764_v51 = vor.u32 %v889_v49, %v763_v48  ;;  %v905_v53 = vld [vmem:[%s1214_s5 + $0x4] sm:$0xf0]  ;;  %v691_v56 = vld [vmem:[%s1214_s5 + $0x8] sm:$0xf0]  ;;  %v886_v57 = vld [vmem:[#allocation5 + $0x74] sm:$0xf] }
  0x21   :  { %v690_v55 = vor.u32 %v905_v53, %v689_v52  ;;  %v757_v58 = vld [vmem:[#allocation5 + $0x78] sm:$0xf0]  ;;  %v694_v59 = vor.u32 %v904_v54, %v691_v56  ;;  %v902_v61 = vld [vmem:[#allocation5 + $0xf4] sm:$0xf]  ;;  %v884_v0 = vld [vmem:[#allocation5 + $0x64] sm:$0xf] }
  0x22   :  { %v760_v60 = vor.u32 %v886_v57, %v757_v58  ;;  %v821_v62 = vld [vmem:[#allocation5 + $0xf8] sm:$0xf0]  ;;  %v749_v1 = vld [vmem:[#allocation5 + $0x68] sm:$0xf0]  ;;  %v900_v2 = vld [vmem:[#allocation5 + $0xe4] sm:$0xf] }
  0x23   :  { %389 = vmatpush.bf16.msra.mxu3 %v732_v26  ;;  %207 = vmatpush.bf16.msra.mxu1 %v690_v55  ;;  %v824_v63 = vor.u32 %v902_v61, %v821_v62  ;;  %v752_v3 = vor.u32 %v884_v0, %v749_v1  ;;  %v813_v4 = vld [vmem:[#allocation5 + $0xe8] sm:$0xf0]  ;;  %v882_v6 = vld [vmem:[#allocation5 + $0x54] sm:$0xf]  ;;  %v741_v7 = vld [vmem:[#allocation5 + $0x58] sm:$0xf0] }
  0x24   :  { %402 = vmatpush.bf16.msra.mxu0 %v796_v27  ;;  %220 = vmatpush.bf16.msrb.mxu2 %v694_v59  ;;  %v816_v5 = vor.u32 %v900_v2, %v813_v4  ;;  %v898_v8 = vld [vmem:[#allocation5 + $0xd4] sm:$0xf]  ;;  %v744_v9 = vor.u32 %v882_v6, %v741_v7  ;;  %v805_v10 = vld [vmem:[#allocation5 + $0xd8] sm:$0xf0]  ;;  %v880_v12 = vld [vmem:[#allocation5 + $0x44] sm:$0xf] }
  0x25   :  { %v808_v11 = vor.u32 %v898_v8, %v805_v10  ;;  %v733_v13 = vld [vmem:[#allocation5 + $0x48] sm:$0xf0]  ;;  %v896_v14 = vld [vmem:[#allocation5 + $0xc4] sm:$0xf]  ;;  %v878_v19 = vld [vmem:[#allocation5 + $0x34] sm:$0xf] }
  0x26   :  { %v736_v16 = vor.u32 %v880_v12, %v733_v13  ;;  %v797_v17 = vld [vmem:[#allocation5 + $0xc8] sm:$0xf0]  ;;  %v725_v20 = vld [vmem:[#allocation5 + $0x38] sm:$0xf0]  ;;  %v103_v21 = vand.u32 127, %v102_v15  ;;  %vm550_vm15 = vcmask 523264  }
  0x27   :  { %390 = vmatpush.bf16.msra.mxu3 %v724_v32  ;;  %412 = vmatpush.bf16.msrb.mxu1 %v760_v60  ;;  %v800_v18 = vor.u32 %v896_v14, %v797_v17  ;;  %v728_v22 = vor.u32 %v878_v19, %v725_v20  ;;  %v894_v23 = vld [vmem:[#allocation5 + $0xb4] sm:$0xf]  ;;  %v789_v24 = vld [vmem:[#allocation5 + $0xb8] sm:$0xf0]  ;;  %v876_v26 = vld [vmem:[#allocation5 + $0x24] sm:$0xf] }
  0x28   :  { %403 = vmatpush.bf16.msra.mxu0 %v788_v33  ;;  %425 = vmatpush.bf16.msra.mxu2 %v824_v63  ;;  %v792_v25 = vor.u32 %v894_v23, %v789_v24  ;;  %v717_v27 = vld [vmem:[#allocation5 + $0x28] sm:$0xf0]  ;;  %v892_v28 = vld [vmem:[#allocation5 + $0xa4] sm:$0xf]  ;;  %v874_v32 = vld [vmem:[#allocation5 + $0x14] sm:$0xf] }
  0x29   :  { %v720_v29 = vor.u32 %v876_v26, %v717_v27  ;;  %v781_v30 = vld [vmem:[#allocation5 + $0xa8] sm:$0xf0]  ;;  %v709_v33 = vld [vmem:[#allocation5 + $0x18] sm:$0xf0]  ;;  %v890_v34 = vld [vmem:[#allocation5 + $0x94] sm:$0xf] }
  0x2a   :  { %v784_v31 = vor.u32 %v892_v28, %v781_v30  ;;  %v773_v35 = vld [vmem:[#allocation5 + $0x98] sm:$0xf0]  ;;  %v104_v36 = vadd.s32 128, %v103_v21  ;;  %v712_v37 = vor.u32 %v874_v32, %v709_v33  ;;  %v701_v40 = vld [vmem:[#allocation5 + $0x8] sm:$0xf0]  ;;  %s1088_s12 = smov [#allocation10]  }
  0x2b   :  { %391 = vmatpush.bf16.msra.mxu3 %v716_v38  ;;  %413 = vmatpush.bf16.msrb.mxu1 %v752_v3  ;;  %v776_v38 = vor.u32 %v890_v34, %v773_v35  ;;  %v888_v42 = vld [vmem:[#allocation5 + $0x84] sm:$0xf]  ;;  %v765_v43 = vld [vmem:[#allocation5 + $0x88] sm:$0xf0]  ;;  %v1086_v46 = vmov 1.0|1.0  }
  0x2c   :  { %404 = vmatpush.bf16.msra.mxu0 %v780_v39  ;;  %426 = vmatpush.bf16.msra.mxu2 %v816_v5  ;;  %v872_v39 = vld [vmem:[#allocation5 + $0x4] sm:$0xf]  ;;  %v768_v47 = vor.u32 %v888_v42, %v765_v43  ;;  %v925_v48 = vld [vmem:[#allocation2] ss:$0 sm:$0xff]  ;;  %v913_v30 = vld [vmem:[#allocation7 + $0x34] sm:$0xf0] }
  0x2d   :  { %v438_v57 = vld [vmem:[%s1215_s6] sm:$0x3]  ;;  %s1087_s6 = smov 64   ;;  %v853_v34 = vld [vmem:[#allocation7 + $0x20] sm:$0xf]  ;;  %s669_s4 = sshll.u32 %s1088_s12, 4  ;;  %s670_s4 = int_to_ptr.vmem [resolvable:$true] %s669_s4 }
  0x2e   :  { %v440_v60 = vperm.slane %v438_v57, 0  ;;  %v441_v7 = vperm.slane %v438_v57, 1  ;;  %v863_v33 = vld [vmem:[#allocation7 + $0x38] sm:$0xf0]  ;;  %v911_v35 = vld [vmem:[#allocation7 + $0x24] sm:$0xf0] }
  0x2f   :  { %392 = vmatpush.bf16.msra.mxu3 %v708_v44  ;;  %414 = vmatpush.bf16.msrb.mxu1 %v744_v9  ;;  %v909_v42 = vld [vmem:[#allocation7 + $0x14] sm:$0xf0]  ;;  %v908_v44 = vld [vmem:[#allocation7 + $0x14] sm:$0xf]  ;;  %s671_s15 = sshll.u32 %s1220_s11, 4  ;;  %s672_s15 = int_to_ptr.hbm [resolvable:$true] %s671_s15 }
  0x30   :  { %405 = vmatpush.bf16.msra.mxu0 %v772_v45  ;;  %427 = vmatpush.bf16.msra.mxu2 %v808_v11  ;;  %v704_v45 = vor.u32 %v872_v39, %v701_v40  ;;  %v854_v39 = vor.u32 %v911_v35, %v853_v34  ;;  %v630_v34 = vld [vmem:[#allocation8 + $0x20] sm:$0xff]  ;;  %v629_v35 = vld [vmem:[#allocation8 + $0x18] sm:$0xff] }
  0x33   :  { %393 = vmatpush.bf16.msra.mxu3 %v700_v50  ;;  %415 = vmatpush.bf16.msrb.mxu1 %v736_v16 }
  0x34   :  { %406 = vmatpush.bf16.msra.mxu0 %v764_v51  ;;  %428 = vmatpush.bf16.msra.mxu2 %v800_v18 }
  0x37   :  { %416 = vmatpush.bf16.msrb.mxu1 %v728_v22 }
  0x38   :  { %429 = vmatpush.bf16.msra.mxu2 %v792_v25 }
  0x3b   :  { %417 = vmatpush.bf16.msrb.mxu1 %v720_v29  ;;  %v861_v29 = vld [vmem:[#allocation7 + $0x30] sm:$0xf] }
  0x3c   :  { %430 = vmatpush.bf16.msra.mxu2 %v784_v31  ;;  %v912_v31 = vld [vmem:[#allocation7 + $0x34] sm:$0xf]  ;;  %v862_v32 = vor.u32 %v913_v30, %v861_v29 }
  0x3e   :  { %558 = vmatpush.bf16.msrb.mxu3 %v862_v32  ;;  %v632_v32 = vld [vmem:[#allocation8 + $0x30] sm:$0xff] }
  0x3f   :  { %418 = vmatpush.bf16.msrb.mxu1 %v712_v37  ;;  %v910_v37 = vld [vmem:[#allocation7 + $0x24] sm:$0xf] }
  0x40   :  { %431 = vmatpush.bf16.msra.mxu2 %v776_v38  ;;  %v855_v38 = vld [vmem:[#allocation7 + $0x28] sm:$0xf0] }
  0x41   :  { %v858_v40 = vor.u32 %v910_v37, %v855_v38  ;;  %v628_v37 = vld [vmem:[#allocation8 + $0x10] sm:$0xff] }
  0x42   :  { %559 = vmatpush.bf16.msrb.mxu3 %v854_v39  ;;  %v627_v39 = vld [vmem:[#allocation8 + $0x8] sm:$0xff] }
  0x43   :  { %419 = vmatpush.bf16.msrb.mxu1 %v704_v45  ;;  %v847_v45 = vld [vmem:[#allocation7 + $0x18] sm:$0xf0] }
  0x44   :  { %432 = vmatpush.bf16.msra.mxu2 %v768_v47 }
  0x88   :  { %v107_v41 = vpop.permute.xlu0 %106 }
  0x89   :  { %vm108_vm2 = vcmp.eq.s32.totalorder %v103_v21, %v107_v41  ;;  %vm109_vm3 = vcmp.eq.s32.totalorder %v104_v36, %v107_v41  ;;  %v866_v36 = vor.u32 %v912_v31, %v863_v33  ;;  %v845_v41 = vld [vmem:[#allocation7 + $0x10] sm:$0xf]  ;;  %v633_v31 = vld [vmem:[#allocation8 + $0x38] sm:$0xff]  ;;  %v631_v33 = vld [vmem:[#allocation8 + $0x28] sm:$0xff] }
  0x8a   :  { %vm1182_vm4 = vmpackc.low %vm108_vm2, %vm108_vm2 }
  0x8b   :  { %826 = vmatmul.msk.bf16.vlgmr.msra.gmra.mxu3 %vm1182_vm4, %v1086_v46  ;;  %vm827_vm5 = vmpackc.low %vm109_vm3, %vm109_vm3  ;;  %571 = vmatpush.bf16.msrb.mxu0 %v866_v36 }
  0x8c   :  { %828 = vmatmul.msk.bf16.vlgmr.msra.gmra.mxu0 %vm827_vm5, %v1086_v46 }
  0x8f   :  { %572 = vmatpush.bf16.msrb.mxu0 %v858_v40  ;;  %v626_v40 = vld [vmem:[#allocation8] sm:$0xff] }
  0x99   :  { %v147_v49 = vpop.f32.mrf.mxu2 }
  0x9a   :  { %v148_v50 = vadd.f32 %v925_v48, %v147_v49  ;;  %v850_v48 = vor.u32 %v908_v44, %v847_v45  ;;  %v837_v49 = vld [vmem:[#allocation7] sm:$0xf] }
  0x9c   :  { %v150_v51 = vmax.f32 %v148_v50, 0.0  ;;  %v907_v50 = vld [vmem:[#allocation7 + $0x4] sm:$0xf0]  ;;  %573 = vmatpush.bf16.msrb.mxu0 %v850_v48 }
  0x9e   :  { %v183_v52 = vpack.c.bf16 %v150_v51, %v150_v51  ;;  %v906_v51 = vld [vmem:[#allocation7 + $0x4] sm:$0xf] }
  0xa0   :  { %695 = vmatmul.msk.bf16.vlgmr.msra.gmra.mxu1 %vm196_vm6, %v183_v52  ;;  %696 = vmatmul.msk.bf16.vlgmr.msrb.gmra.mxu2 %vm196_vm6, %v183_v52  ;;  %v839_v52 = vld [vmem:[#allocation7 + $0x8] sm:$0xf0] }
  0xa1   :  { %651 = vmatpush.msra.mxu1 %v633_v31 }
  0xa3   :  { %652 = vmatpush.msra.mxu1 %v632_v32 }
  0xa5   :  { %653 = vmatpush.msra.mxu1 %v631_v33 }
  0xa7   :  { %654 = vmatpush.msra.mxu1 %v630_v34 }
  0xa9   :  { %655 = vmatpush.msra.mxu1 %v629_v35 }
  0xab   :  { %656 = vmatpush.msra.mxu1 %v628_v37 }
  0xad   :  { %657 = vmatpush.msra.mxu1 %v627_v39 }
  0xaf   :  { %658 = vmatpush.msra.mxu1 %v626_v40 }
  0xb0   :  { %830 = vmatmul.msk.bf16.vlgmr.msrb.gmra.mxu1 %vm1182_vm4, %v1086_v46  ;;  %832 = vmatmul.msk.bf16.vlgmr.msra.gmra.mxu2 %vm827_vm5, %v1086_v46  ;;  %v846_v46 = vor.u32 %v909_v42, %v845_v41 }
  0xb2   :  { %560 = vmatpush.bf16.msrb.mxu3 %v846_v46 }
 0x109   :  { %v408_v53 = vpop.f32.mrf.mxu0 }
 0x10e   :  { %v395_v54 = vpop.f32.mrf.mxu3 }
 0x111   :  { %v410_v55 = vpop.f32.mrf.mxu0 }
 0x112   :  { %v842_v55 = vor.u32 %v906_v51, %v839_v52  ;;  %v926_v52 = vld [vmem:[%s1219_s10] ss:$0 sm:$0xff] }
 0x114   :  { %574 = vmatpush.bf16.msrb.mxu0 %v842_v55 }
 0x116   :  { %v397_v56 = vpop.f32.mrf.mxu3 }
 0x11d   :  { %v209_v58 = vpop.f32.mrf.mxu1 }
 0x11e   :  { %v396_v59 = vadd.f32 %v395_v54, %v209_v58 }
 0x120   :  { %v409_v61 = vadd.f32 %v408_v53, %v396_v59  ;;  %v838_v53 = vor.u32 %v907_v50, %v837_v49 }
 0x122   :  { %v444_v62 = vadd.f32 %v440_v60, %v409_v61  ;;  %561 = vmatpush.bf16.msrb.mxu3 %v838_v53 }
 0x123   :  { %v222_v63 = vpop.f32.mrf.mxu2 }
 0x124   :  { %v833_v0 = vmul.f32 -1.442695, %v444_v62 }
 0x125   :  { %v211_v1 = vpop.f32.mrf.mxu1 }
 0x126   :  { %927 = vpow2.f32 %v833_v0 }
 0x12b   :  { %v224_v2 = vpop.f32.mrf.mxu2 }
 0x12c   :  { %v928_v3 = vpop.eup %927 }
 0x12d   :  { %v449_v4 = vadd.f32 1.0, %v928_v3  ;;  %v421_v5 = vpop.f32.mrf.mxu1 }
 0x12e   :  { %v422_v6 = vadd.f32 %v421_v5, %v222_v63 }
 0x12f   :  { %929 = vrcp.f32 %v449_v4  ;;  %v461_v15 = vand.u32 2147483648, %v449_v4  ;;  %v459_v17 = vand.u32 2147483647, %v449_v4  ;;  %vm455_vm8 = vweird.f32 %v449_v4 }
 0x131   :  { %v462_v20 = vor.u32 1.1754944e-38, %v461_v15  ;;  %vm460_vm10 = vcmp.eq.f32.partialorder %v459_v17, 8.507059e+37 }
 0x133   :  { %v434_v8 = vpop.f32.mrf.mxu2 }
 0x134   :  { %v435_v9 = vadd.f32 %v434_v8, %v422_v6 }
 0x135   :  { %v930_v10 = vpop.eup %929  ;;  %v423_v11 = vpop.f32.mrf.mxu1 }
 0x136   :  { %v451_v12 = vmul.f32 %v930_v10, %v449_v4  ;;  %v445_v13 = vadd.f32 %v441_v7, %v435_v9  ;;  %vm456_vm7 = vweird.f32 %v930_v10  ;;  %v501_v4 = vld [vmem:[%s1217_s8] sm:$0x3] }
 0x137   :  { %vm457_vm9 = vmor %vm455_vm8, %vm456_vm7  ;;  %v503_v5 = vperm.slane %v501_v4, 0 }
 0x138   :  { %v452_v14 = vsub.f32 1.0, %v451_v12  ;;  %931 = vtanh.f32 %v445_v13  ;;  %v834_v26 = vmul.f32 -1.442695, %v445_v13  ;;  %v504_v13 = vperm.slane %v501_v4, 1 }
 0x13a   :  { %v453_v16 = vmul.f32 %v930_v10, %v452_v14 }
 0x13b   :  { %v436_v18 = vpop.f32.mrf.mxu2 }
 0x13c   :  { %v454_v19 = vadd.f32 %v930_v10, %v453_v16 }
 0x13e   :  { %v932_v21 = vpop.eup %931  ;;  %v458_v22 = vsel %vm457_vm9, %v930_v10, %v454_v19 }
 0x13f   :  { %v463_v23 = vsel %vm460_vm10, %v462_v20, %v458_v22 }
 0x140   :  { %v485_v24 = vmul.f32 %v932_v21, %v463_v23 }
 0x142   :  { %933 = vtanh.f32 %v485_v24 }
 0x143   :  { %935 = vpow2.f32 %v834_v26 }
 0x148   :  { %v934_v25 = vpop.eup %933 }
 0x149   :  { %488 = vrot.lane.b32.xlu0 %v934_v25, %s1087_s6  ;;  %v936_v27 = vpop.eup %935 }
 0x14a   :  { %v469_v28 = vadd.f32 1.0, %v936_v27 }
 0x14c   :  { %937 = vrcp.f32 %v469_v28  ;;  %v481_v58 = vand.u32 2147483648, %v469_v28  ;;  %vm475_vm12 = vweird.f32 %v469_v28  ;;  %v479_v59 = vand.u32 2147483647, %v469_v28 }
 0x14e   :  { %v482_v61 = vor.u32 1.1754944e-38, %v481_v58  ;;  %vm480_vm14 = vcmp.eq.f32.partialorder %v479_v59, 8.507059e+37 }
 0x152   :  { %v938_v43 = vpop.eup %937 }
 0x153   :  { %v471_v47 = vmul.f32 %v938_v43, %v469_v28  ;;  %vm476_vm11 = vweird.f32 %v938_v43 }
 0x154   :  { %vm477_vm13 = vmor %vm475_vm12, %vm476_vm11 }
 0x155   :  { %v472_v54 = vsub.f32 1.0, %v471_v47 }
 0x157   :  { %v473_v56 = vmul.f32 %v938_v43, %v472_v54 }
 0x159   :  { %v474_v57 = vadd.f32 %v938_v43, %v473_v56 }
 0x15b   :  { %v478_v60 = vsel %vm477_vm13, %v938_v43, %v474_v57 }
 0x15c   :  { %v483_v62 = vsel %vm480_vm14, %v482_v61, %v478_v60 }
 0x1bb   :  { %v489_v63 = vpop.permute.xlu0 %488 }
 0x1bc   :  { %v491_v0 = vmul.f32 %v489_v63, %v483_v62 }
 0x1be   :  { %v492_v1 = vpack.c.bf16 %v491_v0, %v491_v0 }
 0x1c0   :  { %508 = vrot.lane.b32.xlu1 %v492_v1, %s1087_s6 }
 0x232   :  { %v509_v2 = vpop.permute.xlu1 %508 }
 0x233   :  { %867 = vmatmul.msk.bf16.vlgmr.msrb.gmra.mxu3 %vm550_vm15, %v509_v2  ;;  %868 = vmatmul.msk.bf16.vlgmr.msrb.gmra.mxu0 %vm550_vm15, %v509_v2 }
 0x2b0   :  { %v576_v3 = vpop.f32.mrf.mxu0 }
 0x2b1   :  { %v577_v15 = vadd.f32 %v576_v3, %v504_v13 }
 0x2b3   :  { %v870_v28 = vmul.f32 -1.442695, %v577_v15 }
 0x2b6   :  { %v563_v6 = vpop.f32.mrf.mxu3 }
 0x2b7   :  { %v564_v7 = vadd.f32 %v563_v6, %v503_v5 }
 0x2b8   :  { %v578_v8 = vpop.f32.mrf.mxu0 }
 0x2b9   :  { %v869_v9 = vmul.f32 -1.442695, %v564_v7 }
 0x2bb   :  { %939 = vpow2.f32 %v869_v9 }
 0x2be   :  { %v565_v10 = vpop.f32.mrf.mxu3 }
 0x2c1   :  { %v940_v11 = vpop.eup %939 }
 0x2c2   :  { %v583_v12 = vadd.f32 1.0, %v940_v11 }
 0x2c4   :  { %941 = vrcp.f32 %v583_v12  ;;  %v595_v18 = vand.u32 2147483648, %v583_v12  ;;  %v593_v20 = vand.u32 2147483647, %v583_v12  ;;  %vm589_vm1 = vweird.f32 %v583_v12 }
 0x2c5   :  { %943 = vtanh.f32 %v577_v15 }
 0x2c6   :  { %v596_v22 = vor.u32 1.1754944e-38, %v595_v18  ;;  %vm594_vm3 = vcmp.eq.f32.partialorder %v593_v20, 8.507059e+37 }
 0x2ca   :  { %v942_v14 = vpop.eup %941 }
 0x2cb   :  { %v585_v16 = vmul.f32 %v942_v14, %v583_v12  ;;  %vm590_vm0 = vweird.f32 %v942_v14  ;;  %v944_v24 = vpop.eup %943 }
 0x2cc   :  { %vm591_vm2 = vmor %vm589_vm1, %vm590_vm0 }
 0x2cd   :  { %v586_v17 = vsub.f32 1.0, %v585_v16 }
 0x2cf   :  { %v587_v19 = vmul.f32 %v942_v14, %v586_v17 }
 0x2d1   :  { %v588_v21 = vadd.f32 %v942_v14, %v587_v19 }
 0x2d3   :  { %v592_v23 = vsel %vm591_vm2, %v942_v14, %v588_v21 }
 0x2d4   :  { %v597_v25 = vsel %vm594_vm3, %v596_v22, %v592_v23 }
 0x2d5   :  { %v619_v26 = vmul.f32 %v944_v24, %v597_v25 }
 0x2d7   :  { %945 = vtanh.f32 %v619_v26 }
 0x2d8   :  { %947 = vpow2.f32 %v870_v28 }
 0x2dd   :  { %v946_v27 = vpop.eup %945 }
 0x2de   :  { %622 = vrot.lane.b32.xlu1 %v946_v27, %s1087_s6  ;;  %v948_v29 = vpop.eup %947 }
 0x2df   :  { %v603_v30 = vadd.f32 1.0, %v948_v29 }
 0x2e1   :  { %949 = vrcp.f32 %v603_v30  ;;  %v615_v44 = vand.u32 2147483648, %v603_v30  ;;  %vm609_vm5 = vweird.f32 %v603_v30  ;;  %v613_v45 = vand.u32 2147483647, %v603_v30 }
 0x2e3   :  { %v616_v47 = vor.u32 1.1754944e-38, %v615_v44  ;;  %vm614_vm7 = vcmp.eq.f32.partialorder %v613_v45, 8.507059e+37 }
 0x2e7   :  { %v950_v36 = vpop.eup %949 }
 0x2e8   :  { %v605_v38 = vmul.f32 %v950_v36, %v603_v30  ;;  %vm610_vm4 = vweird.f32 %v950_v36 }
 0x2e9   :  { %vm611_vm6 = vmor %vm609_vm5, %vm610_vm4 }
 0x2ea   :  { %v606_v41 = vsub.f32 1.0, %v605_v38 }
 0x2ec   :  { %v607_v42 = vmul.f32 %v950_v36, %v606_v41 }
 0x2ee   :  { %v608_v43 = vadd.f32 %v950_v36, %v607_v42 }
 0x2f0   :  { %v612_v46 = vsel %vm611_vm6, %v950_v36, %v608_v43 }
 0x2f1   :  { %v617_v48 = vsel %vm614_vm7, %v616_v47, %v612_v46 }
 0x350   :  { %v623_v49 = vpop.permute.xlu1 %622 }
 0x351   :  { %v625_v50 = vmul.f32 %v623_v49, %v617_v48 }
 0x353   :  { %639 = vrot.lane.b32.xlu2 %v625_v50, %s1087_s6 }
 0x3ad   :  { %v640_v51 = vpop.permute.xlu2 %639 }
 0x3ae   :  { %871 = vmatmul.msk.f32.vlgmr.msra.gmra.mxu1 %vm550_vm15, %v640_v51 }
 0x42b   :  { %v660_v53 = vpop.f32.mrf.mxu1 }
 0x42c   :  { %v661_v54 = vadd.f32 %v926_v52, %v660_v53 }
 0x42e   :  { %663 = vst [vmem:[#allocation10] sm:$0xff] %v661_v54 }
 0x42f   :  { %674 = dma.vmem_to_hbm [thread:$0]  %s670_s4, 128, %s672_s15, [#allocation4]  }
 0x430   :  { %1077 = dma.done.wait [#allocation4], 128  }
 0x431   :  { %1078 = vsyncadd [#allocation4], 4294967168 }
 0x432   :  { %679 = vsyncpa [#allocation3], 1 }
 0x433   :  { %680 = vsyncpa [#allocation6], 1 }
 0x434   :  { %681 = vsyncpa [#allocation9], 1 }
 0x435   :  { %682 = vsyncpa [#allocation4], 1 }

</bundles_post_ra>
